<compile_context>
chip_gen: v7x
topology: tpu7x:2x2x1
jax: 0.10.0
libtpu: 0.0.40
codegen_flags: <defaults>
</compile_context>

<pallas_src>
import functools

import jax
import jax.numpy as jnp
from jax.experimental import pallas as pl
from jax.experimental.pallas import tpu as pltpu


def _round_up(n, m):
    return (n + m - 1) // m * m


def _default_elementwise_dtype():
    # bf16 VPU/EUP only on v6e/v7x; keep f32 elementwise on v5e and older.
    try:
        kind = jax.devices()[0].device_kind.lower()
    except Exception:
        return jnp.float32
    if "v6" in kind or "v7" in kind:
        return jnp.bfloat16
    return jnp.float32


def _mlp_kernel(xT_ref,
                w1_ref, b1_ref,
                w25_ref, b25_ref,
                w2_ref, b2_ref,
                w3_ref, b3_ref,
                o_ref, *, ew_dtype):
    def tanh_layer(w_ref, b_ref, h):
        # bf16 x bf16 MXU matmul, f32 accumulate, bias add, tanh (single EUP op).
        z = jnp.dot(w_ref[...], h.astype(jnp.bfloat16),
                    preferred_element_type=jnp.float32) + b_ref[...]
        return jnp.tanh(z.astype(ew_dtype))

    t = tanh_layer(w1_ref, b1_ref, xT_ref[...])     # [100, TB]
    t = tanh_layer(w25_ref, b25_ref, t)             # [100, TB]
    t = tanh_layer(w2_ref, b2_ref, t)               # [50, TB]

    # fc3 (50 -> 1): VPU multiply + sublane (XLU) reduce; avoids an M=1 MXU pass.
    out = jnp.sum(t * w3_ref[...], axis=0, keepdims=True) + b3_ref[...]   # [1, TB]
    o_ref[...] = out.astype(o_ref.dtype)            # lane-dense full-width vst


def _fold_params(params):
    """Fold sigmoid(z) = 0.5*tanh(0.5*z) + 0.5 into the layer weights.

    Returns effective weights so the kernel computes:
      t1 = tanh(W1e x   + b1e)
      t2 = tanh(W25e t1 + b25e)
      t3 = tanh(W2e t2  + b2e)
      y  = sum(t3 * w3col, axis=0) + b3e
    """
    w1, b1 = params["fc1"]
    w25, b25 = params["fc2_5"]
    w2, b2 = params["fc2"]
    w3, b3 = params["fc3"]

    w1e, b1e = 0.5 * w1, 0.5 * b1
    w25e = 0.25 * w25
    b25e = 0.5 * b25 + 0.25 * jnp.sum(w25, axis=1, keepdims=True)
    w2e = 0.25 * w2
    b2e = 0.5 * b2 + 0.25 * jnp.sum(w2, axis=1, keepdims=True)
    w3e = 0.5 * w3                                              # [1, 50]
    b3e = b3 + 0.5 * jnp.sum(w3, axis=1, keepdims=True)         # [1, 1]

    bf16 = jnp.bfloat16
    return (w1e.astype(bf16), b1e.astype(jnp.float32),
            w25e.astype(bf16), b25e.astype(jnp.float32),
            w2e.astype(bf16), b2e.astype(jnp.float32),
            w3e.T.astype(jnp.float32),                          # [50, 1] column for VPU
            b3e.astype(jnp.float32))


def _choose_tb(B, block_batch):
    q = 256                                   # multiple of 256 (MXU N-tiles on v6e/v7x)
    b_min = _round_up(max(B, 1), q)
    tb = min(_round_up(block_batch, q), b_min)
    # If a single tile would cover the whole batch but it is big enough to split,
    # use >=2 tiles so ("parallel",) can shard across v7x's 2 TensorCores.
    if tb == b_min and b_min >= 2 * q:
        tb = pl.cdiv(b_min // q, 2) * q
    return tb


def finger_forcer_forward(x, params, *, block_batch=4096, elementwise_dtype=None):
    """x: [B, 14] float32.  params: dict layer -> (W [out,in], b [out,1]).

    Returns [B, 1] float32, matching FingerForcer.forward.
    """
    if elementwise_dtype is None:
        elementwise_dtype = _default_elementwise_dtype()

    B = x.shape[0]
    w1e, b1e, w25e, b25e, w2e, b2e, w3col, b3e = _fold_params(params)

    TB = _choose_tb(B, block_batch)
    B_pad = _round_up(max(B, 1), TB)
    grid = (B_pad // TB,)

    # Batch on the lane axis, zero-padded to a tile multiple, bf16 for the MXU/DMA.
    xT = jnp.pad(x.T, ((0, 0), (0, B_pad - B))).astype(jnp.bfloat16)     # [14, B_pad]

    # Tiny weights: full-array blocks with a constant index_map -> resident in VMEM.
    full = lambda a: pl.BlockSpec(a.shape, lambda i: (0,) * a.ndim)

    weight_bytes = sum(int(a.size) * a.dtype.itemsize
                       for a in (w1e, b1e, w25e, b25e, w2e, b2e, w3col, b3e))
    cost = pl.CostEstimate(
        flops=2 * B_pad * (14 * 100 + 100 * 100 + 100 * 50 + 50 * 1),
        transcendentals=B_pad * (100 + 100 + 50),
        bytes_accessed=B_pad * 14 * 2 + B_pad * 1 * 4 + weight_bytes,
    )

    kernel = functools.partial(_mlp_kernel, ew_dtype=elementwise_dtype)

    out = pl.pallas_call(
        kernel,
        out_shape=jax.ShapeDtypeStruct((1, B_pad), jnp.float32),
        grid=grid,
        in_specs=[
            pl.BlockSpec((14, TB), lambda i: (0, i)),     # x^T tile, batch on lanes
            full(w1e), full(b1e),
            full(w25e), full(b25e),
            full(w2e), full(b2e),
            full(w3col), full(b3e),
        ],
        out_specs=pl.BlockSpec((1, TB), lambda i: (0, i)),
        compiler_params=pltpu.CompilerParams(
            dimension_semantics=("parallel",),            # shard batch tiles across TCs
        ),
        cost_estimate=cost,
    )(xT, w1e, b1e, w25e, b25e, w2e, b2e, w3col, b3e)

    return out[:, :B].T                                    # [B, 1]


def init_params(key):
    """nn.Linear-style init: U(-1/sqrt(fan_in), 1/sqrt(fan_in)); W [out,in], b [out,1]."""
    layer_dims = {"fc1": (14, 100), "fc2_5": (100, 100), "fc2": (100, 50), "fc3": (50, 1)}
    params = {}
    for name, (fin, fout) in layer_dims.items():
        key, kw, kb = jax.random.split(key, 3)
        bound = 1.0 / jnp.sqrt(jnp.float32(fin))
        w = jax.random.uniform(kw, (fout, fin), jnp.float32, -bound, bound)
        b = jax.random.uniform(kb, (fout, 1), jnp.float32, -bound, bound)
        params[name] = (w, b)
    return params


def _reference(x, params):
    def lin(h, name):
        w, b = params[name]
        return h @ w.T + b[:, 0]
    h = jax.nn.sigmoid(lin(x, "fc1"))
    h = jax.nn.sigmoid(lin(h, "fc2_5"))
    h = jax.nn.sigmoid(lin(h, "fc2"))
    return lin(h, "fc3")


if __name__ == "__main__":
    key = jax.random.PRNGKey(0)
    key, kx1, kx2 = jax.random.split(key, 3)
    params = init_params(key)

    fwd = jax.jit(functools.partial(finger_forcer_forward, block_batch=4096))

    # Small batch (single tile, heavy padding).
    B = 8
    x = jax.random.normal(kx1, (B, 14), jnp.float32)
    out = jax.block_until_ready(fwd(x, params))
    ref = _reference(x, params)
    assert out.shape == (B, 1), out.shape
    assert jnp.allclose(out, ref, atol=1e-2, rtol=1e-2), (
        f"max abs err {jnp.max(jnp.abs(out - ref))}"
    )

    # Larger batch (exercises multi-tile grid + padding slice-off).
    B2 = 300
    x2 = jax.random.normal(kx2, (B2, 14), jnp.float32)
    out2 = jax.block_until_ready(fwd(x2, params))
    ref2 = _reference(x2, params)
    assert out2.shape == (B2, 1), out2.shape
    assert jnp.allclose(out2, ref2, atol=1e-2, rtol=1e-2), (
        f"max abs err {jnp.max(jnp.abs(out2 - ref2))}"
    )

    print("KERNEL_OK")
</pallas_src>

<mosaic_0001>
module attributes {stable_mosaic.version = 11 : i64} {
  func.func @_mlp_kernel(%arg0: i32, %arg1: memref<14x256xbf16, #tpu.memory_space<vmem>>, %arg2: memref<100x14xbf16, #tpu.memory_space<vmem>>, %arg3: memref<100x1xf32, #tpu.memory_space<vmem>>, %arg4: memref<100x100xbf16, #tpu.memory_space<vmem>>, %arg5: memref<100x1xf32, #tpu.memory_space<vmem>>, %arg6: memref<50x100xbf16, #tpu.memory_space<vmem>>, %arg7: memref<50x1xf32, #tpu.memory_space<vmem>>, %arg8: memref<50x1xf32, #tpu.memory_space<vmem>>, %arg9: memref<1x1xf32, #tpu.memory_space<vmem>>, %arg10: memref<1x256xf32, #tpu.memory_space<vmem>>) attributes {dimension_semantics = [#tpu.dimension_semantics<parallel>], iteration_bounds = array<i64: 1>, scalar_prefetch = 0 : i64, scratch_operands = 0 : i64, tpu.core_type = #tpu.core_type<tc>, window_params = [{transform_indices = @transform_0, window_bounds = array<i64: 14, 256>}, {pipeline_mode = #tpu.pipeline_mode<synchronous>, transform_indices = @transform_1, window_bounds = array<i64: 100, 14>}, {pipeline_mode = #tpu.pipeline_mode<synchronous>, transform_indices = @transform_2, window_bounds = array<i64: 100, 1>}, {pipeline_mode = #tpu.pipeline_mode<synchronous>, transform_indices = @transform_3, window_bounds = array<i64: 100, 100>}, {pipeline_mode = #tpu.pipeline_mode<synchronous>, transform_indices = @transform_4, window_bounds = array<i64: 100, 1>}, {pipeline_mode = #tpu.pipeline_mode<synchronous>, transform_indices = @transform_5, window_bounds = array<i64: 50, 100>}, {pipeline_mode = #tpu.pipeline_mode<synchronous>, transform_indices = @transform_6, window_bounds = array<i64: 50, 1>}, {pipeline_mode = #tpu.pipeline_mode<synchronous>, transform_indices = @transform_7, window_bounds = array<i64: 50, 1>}, {pipeline_mode = #tpu.pipeline_mode<synchronous>, transform_indices = @transform_8, window_bounds = array<i64: 1, 1>}, {transform_indices = @transform_9, window_bounds = array<i64: 1, 256>}]} {
    %c0 = arith.constant 0 : index
    %c0_0 = arith.constant 0 : index
    %0 = vector.load %arg1[%c0, %c0_0] : memref<14x256xbf16, #tpu.memory_space<vmem>>, vector<14x256xbf16>
    %c0_1 = arith.constant 0 : index
    %c0_2 = arith.constant 0 : index
    %1 = vector.load %arg2[%c0_1, %c0_2] : memref<100x14xbf16, #tpu.memory_space<vmem>>, vector<100x14xbf16>
    %cst = arith.constant dense<0.000000e+00> : vector<100x256xf32>
    %2 = tpu.matmul %1, %0, %cst {dimension_numbers = #tpu.dot_dimension_numbers<[1], [0], [0], [1], [0, 0, 1, 1], [], []>} : vector<100x14xbf16>, vector<14x256xbf16>, vector<100x256xf32> -> vector<100x256xf32>
    %c0_3 = arith.constant 0 : index
    %c0_4 = arith.constant 0 : index
    %3 = vector.load %arg3[%c0_3, %c0_4] : memref<100x1xf32, #tpu.memory_space<vmem>>, vector<100x1xf32>
    %4 = vector.broadcast %3 : vector<100x1xf32> to vector<100x256xf32>
    %5 = arith.addf %2, %4 : vector<100x256xf32>
    %6 = math.tanh %5 : vector<100x256xf32>
    %c0_5 = arith.constant 0 : index
    %c0_6 = arith.constant 0 : index
    %7 = vector.load %arg4[%c0_5, %c0_6] : memref<100x100xbf16, #tpu.memory_space<vmem>>, vector<100x100xbf16>
    %8 = arith.truncf %6 : vector<100x256xf32> to vector<100x256xbf16>
    %cst_7 = arith.constant dense<0.000000e+00> : vector<100x256xf32>
    %9 = tpu.matmul %7, %8, %cst_7 {dimension_numbers = #tpu.dot_dimension_numbers<[1], [0], [0], [1], [0, 0, 1, 1], [], []>} : vector<100x100xbf16>, vector<100x256xbf16>, vector<100x256xf32> -> vector<100x256xf32>
    %c0_8 = arith.constant 0 : index
    %c0_9 = arith.constant 0 : index
    %10 = vector.load %arg5[%c0_8, %c0_9] : memref<100x1xf32, #tpu.memory_space<vmem>>, vector<100x1xf32>
    %11 = vector.broadcast %10 : vector<100x1xf32> to vector<100x256xf32>
    %12 = arith.addf %9, %11 : vector<100x256xf32>
    %13 = math.tanh %12 : vector<100x256xf32>
    %c0_10 = arith.constant 0 : index
    %c0_11 = arith.constant 0 : index
    %14 = vector.load %arg6[%c0_10, %c0_11] : memref<50x100xbf16, #tpu.memory_space<vmem>>, vector<50x100xbf16>
    %15 = arith.truncf %13 : vector<100x256xf32> to vector<100x256xbf16>
    %cst_12 = arith.constant dense<0.000000e+00> : vector<50x256xf32>
    %16 = tpu.matmul %14, %15, %cst_12 {dimension_numbers = #tpu.dot_dimension_numbers<[1], [0], [0], [1], [0, 0, 1, 1], [], []>} : vector<50x100xbf16>, vector<100x256xbf16>, vector<50x256xf32> -> vector<50x256xf32>
    %c0_13 = arith.constant 0 : index
    %c0_14 = arith.constant 0 : index
    %17 = vector.load %arg7[%c0_13, %c0_14] : memref<50x1xf32, #tpu.memory_space<vmem>>, vector<50x1xf32>
    %18 = vector.broadcast %17 : vector<50x1xf32> to vector<50x256xf32>
    %19 = arith.addf %16, %18 : vector<50x256xf32>
    %20 = math.tanh %19 : vector<50x256xf32>
    %c0_15 = arith.constant 0 : index
    %c0_16 = arith.constant 0 : index
    %21 = vector.load %arg8[%c0_15, %c0_16] : memref<50x1xf32, #tpu.memory_space<vmem>>, vector<50x1xf32>
    %22 = vector.broadcast %21 : vector<50x1xf32> to vector<50x256xf32>
    %23 = arith.mulf %20, %22 : vector<50x256xf32>
    %cst_17 = arith.constant dense<0.000000e+00> : vector<256xf32>
    %24 = vector.multi_reduction <add>, %23, %cst_17 [0] : vector<50x256xf32> to vector<256xf32>
    %25 = vector.shape_cast %24 : vector<256xf32> to vector<1x256xf32>
    %c0_18 = arith.constant 0 : index
    %c0_19 = arith.constant 0 : index
    %26 = vector.load %arg9[%c0_18, %c0_19] : memref<1x1xf32, #tpu.memory_space<vmem>>, vector<1x1xf32>
    %27 = vector.broadcast %26 : vector<1x1xf32> to vector<1x256xf32>
    %28 = arith.addf %25, %27 : vector<1x256xf32>
    %c0_20 = arith.constant 0 : index
    %c0_21 = arith.constant 0 : index
    %29 = vector.load %arg10[%c0_20, %c0_21] : memref<1x256xf32, #tpu.memory_space<vmem>>, vector<1x256xf32>
    tpu.vector_store %arg10[%c0_20, %c0_21], %28 {strides = array<i32>} : memref<1x256xf32, #tpu.memory_space<vmem>>, vector<1x256xf32>,
    return
  }
  func.func @transform_0(%arg0: i32) -> (i32, i32) {
    %c0_i32 = arith.constant 0 : i32
    %c0_i32_0 = arith.constant 0 : i32
    return %c0_i32, %arg0 : i32, i32
  }
  func.func @transform_1(%arg0: i32) -> (i32, i32) {
    %c0_i32 = arith.constant 0 : i32
    %c0_i32_0 = arith.constant 0 : i32
    %c0_i32_1 = arith.constant 0 : i32
    return %c0_i32, %c0_i32_0 : i32, i32
  }
  func.func @transform_2(%arg0: i32) -> (i32, i32) {
    %c0_i32 = arith.constant 0 : i32
    %c0_i32_0 = arith.constant 0 : i32
    %c0_i32_1 = arith.constant 0 : i32
    return %c0_i32, %c0_i32_0 : i32, i32
  }
  func.func @transform_3(%arg0: i32) -> (i32, i32) {
    %c0_i32 = arith.constant 0 : i32
    %c0_i32_0 = arith.constant 0 : i32
    %c0_i32_1 = arith.constant 0 : i32
    return %c0_i32, %c0_i32_0 : i32, i32
  }
  func.func @transform_4(%arg0: i32) -> (i32, i32) {
    %c0_i32 = arith.constant 0 : i32
    %c0_i32_0 = arith.constant 0 : i32
    %c0_i32_1 = arith.constant 0 : i32
    return %c0_i32, %c0_i32_0 : i32, i32
  }
  func.func @transform_5(%arg0: i32) -> (i32, i32) {
    %c0_i32 = arith.constant 0 : i32
    %c0_i32_0 = arith.constant 0 : i32
    %c0_i32_1 = arith.constant 0 : i32
    return %c0_i32, %c0_i32_0 : i32, i32
  }
  func.func @transform_6(%arg0: i32) -> (i32, i32) {
    %c0_i32 = arith.constant 0 : i32
    %c0_i32_0 = arith.constant 0 : i32
    %c0_i32_1 = arith.constant 0 : i32
    return %c0_i32, %c0_i32_0 : i32, i32
  }
  func.func @transform_7(%arg0: i32) -> (i32, i32) {
    %c0_i32 = arith.constant 0 : i32
    %c0_i32_0 = arith.constant 0 : i32
    %c0_i32_1 = arith.constant 0 : i32
    return %c0_i32, %c0_i32_0 : i32, i32
  }
  func.func @transform_8(%arg0: i32) -> (i32, i32) {
    %c0_i32 = arith.constant 0 : i32
    %c0_i32_0 = arith.constant 0 : i32
    %c0_i32_1 = arith.constant 0 : i32
    return %c0_i32, %c0_i32_0 : i32, i32
  }
  func.func @transform_9(%arg0: i32) -> (i32, i32) {
    %c0_i32 = arith.constant 0 : i32
    %c0_i32_0 = arith.constant 0 : i32
    return %c0_i32, %arg0 : i32, i32
  }
}

</mosaic_0001>

<bundles_post_ra>
// kernel: finger_forcer_forward.1
= control target key start
LH: loop header
LB: loop body
LE: loop exit
PB: predicated region body
PF: predicated region fallthrough
CT: control target
= control target key end

     0   :  { %vm191_vm0 = vcmask 1046528   ;;  %v1124_v1 = vmov 0   ;;  %vm169_vm1 = vcmask 113664   ;;  %vm485_vm2 = vcmask 1041408   ;;  %s1434_s0 = inlined_call_operand.vmem [shape: bf16[14,256], index: 0, kind: input, shape index: {}]   ;;  %s1435_s1 = inlined_call_operand.vmem [shape: bf16[100,14], index: 1, kind: input, shape index: {}]   ;;  %s1436_s8 = inlined_call_operand.<no memory space> [shape: f32[1,1], index: 8, kind: input, shape index: {}]   ;;  %s1437_s2 = inlined_call_operand.vmem [shape: f32[100,1], index: 2, kind: input, shape index: {}]   ;;  %s1438_s4 = inlined_call_operand.vmem [shape: f32[100,1], index: 4, kind: input, shape index: {}]   ;;  %s1439_s6 = inlined_call_operand.vmem [shape: f32[50,1], index: 6, kind: input, shape index: {}]   ;;  %s1440_s7 = inlined_call_operand.vmem [shape: f32[50,1], index: 7, kind: input, shape index: {}]   ;;  %s1441_s3 = inlined_call_operand.vmem [shape: bf16[100,100], index: 3, kind: input, shape index: {}]   ;;  %s1442_s5 = inlined_call_operand.vmem [shape: bf16[50,100], index: 5, kind: input, shape index: {}]   ;;  %s1443_s9 = inlined_call_operand.vmem [shape: f32[1,256], index: 9, kind: output, shape index: {}]  }
   0x1   :  { %v971_v0 = vld [vmem:[%s1434_s0 + $0x4] ss:$8 sps:$4 sm:$0x7f]   ;;  %230 = vmatprep.mubr.bf16.mxu0 %v1124_v1  ;;  %270 = vmatprep.mubr.bf16.mxu1 %v1124_v1  ;;  %v14_v2 = vstv %s1436_s8  ;;  %v973_v3 = vld [vmem:[%s1434_s0] ss:$8 sps:$4 sm:$0x7f]  }
   0x2   :  { %v974_v4 = vld [vmem:[%s1435_s1] sm:$0xff]   ;;  %969 = vset.pattern.permute.xlu0 %v1124_v1  ;;  %970 = vset.pattern.permute.xlu1 %v1124_v1  ;;  %15 = vst [vmem:[#allocation2] sm:$0x1] %v14_v2  ;;  %v193_v5 = vsel %vm191_vm0, %v973_v3, 0  ;;  %v51_v8 = vld [vmem:[%s1437_s2 + $0x8] sm:$0xff]  ;;  %v52_v9 = vld [vmem:[%s1437_s2 + $0x10] sm:$0xff] }
   0x3   :  { %933 = vmatprep.subr.msk.bf16.mxu0 %vm191_vm0, %v971_v0  ;;  %965 = vmatprep.subr.msk.bf16.mxu1 %vm191_vm0, %v971_v0  ;;  %v975_v6 = vld [vmem:[%s1435_s1 + $0x20] sm:$0xff]   ;;  %v53_v10 = vld [vmem:[%s1437_s2 + $0x18] sm:$0xff]  ;;  %v976_v11 = vld [vmem:[%s1435_s1 + $0x8] sm:$0xff]   ;;  %vm463_vm3 = vcmask 818176  }
   0x4   :  { %199 = vmatpush1.bf16.msra.mxu0 %v193_v5  ;;  %966 = vmatpush1.bf16.msra.mxu1 %v193_v5  ;;  %v50_v7 = vld [vmem:[%s1437_s2] sm:$0xff]  ;;  %v977_v12 = vld [vmem:[%s1435_s1 + $0x28] sm:$0xff]   ;;  %v56_v15 = vld [vmem:[%s1437_s2 + $0x30] sm:$0xff] }
   0x5   :  { %65 = vperm.xlu0 %969, %v50_v7   ;;  %75 = vperm.xlu1 %970, %v52_v9   ;;  %v54_v13 = vld [vmem:[%s1437_s2 + $0x20] sm:$0xff]  ;;  %v55_v14 = vld [vmem:[%s1437_s2 + $0x28] sm:$0xff]  ;;  %v57_v16 = vld [vmem:[%s1437_s2 + $0x38] sm:$0xff] }
   0x6   :  { %v978_v17 = vld [vmem:[%s1435_s1 + $0x10] sm:$0xff]   ;;  %v58_v19 = vld [vmem:[%s1437_s2 + $0x40] sm:$0xff]  ;;  %v59_v20 = vld [vmem:[%s1437_s2 + $0x48] sm:$0xff] }
   0x7   :  { %934 = vmatmul.mubr.msk.bf16.vlgmr.msra.gmra.mrb[0].mxu0 %vm169_vm1, %v974_v4  ;;  %938 = vmatmul.mubr.msk.bf16.vlgmr.msra.gmra.mrb[0].mxu1 %vm169_vm1, %v975_v6  ;;  %v979_v18 = vld [vmem:[%s1435_s1 + $0x30] ss:$0 sps:$4 sm:$0x33]   ;;  %v61_v22 = vld [vmem:[%s1437_s2 + $0x58] sm:$0xff]  ;;  %v62_v24 = vld [vmem:[%s1437_s2 + $0x60] sm:$0xf] }
   0x8   :  { %240 = vmatprep.mubr.bf16.mxu0 %v1124_v1  ;;  %280 = vmatprep.mubr.bf16.mxu1 %v1124_v1  ;;  %v60_v21 = vld [vmem:[%s1437_s2 + $0x50] sm:$0xff]  ;;  %v980_v23 = vld [vmem:[%s1435_s1 + $0x18] sm:$0xff]   ;;  %v352_v25 = vld [vmem:[%s1438_s4] sm:$0xff] }
   0x9   :  { %70 = vperm.xlu0 %969, %v51_v8   ;;  %80 = vperm.xlu1 %970, %v53_v10   ;;  %v353_v26 = vld [vmem:[%s1438_s4 + $0x8] sm:$0xff]  ;;  %v354_v27 = vld [vmem:[%s1438_s4 + $0x10] sm:$0xff]  ;;  %v355_v28 = vld [vmem:[%s1438_s4 + $0x18] sm:$0xff] }
   0xa   :  { %v356_v29 = vld [vmem:[%s1438_s4 + $0x20] sm:$0xff]  ;;  %v357_v30 = vld [vmem:[%s1438_s4 + $0x28] sm:$0xff]  ;;  %v358_v31 = vld [vmem:[%s1438_s4 + $0x30] sm:$0xff] }
   0xb   :  { %v359_v32 = vld [vmem:[%s1438_s4 + $0x38] sm:$0xff]  ;;  %v360_v33 = vld [vmem:[%s1438_s4 + $0x40] sm:$0xff]  ;;  %v361_v34 = vld [vmem:[%s1438_s4 + $0x48] sm:$0xff] }
   0xc   :  { %v362_v35 = vld [vmem:[%s1438_s4 + $0x50] sm:$0xff]  ;;  %v363_v36 = vld [vmem:[%s1438_s4 + $0x58] sm:$0xff]  ;;  %v364_v37 = vld [vmem:[%s1438_s4 + $0x60] sm:$0xf] }
   0xd   :  { %85 = vperm.xlu0 %969, %v54_v13   ;;  %90 = vperm.xlu1 %970, %v55_v14   ;;  %v640_v38 = vld [vmem:[%s1439_s6] sm:$0xff]  ;;  %v641_v39 = vld [vmem:[%s1439_s6 + $0x8] sm:$0xff]  ;;  %v642_v40 = vld [vmem:[%s1439_s6 + $0x10] sm:$0xff] }
   0xe   :  { %v643_v41 = vld [vmem:[%s1439_s6 + $0x18] sm:$0xff]  ;;  %v644_v42 = vld [vmem:[%s1439_s6 + $0x20] sm:$0xff]  ;;  %v645_v43 = vld [vmem:[%s1439_s6 + $0x28] sm:$0xff] }
   0xf   :  { %935 = vmatmul.mubr.msk.bf16.gmra.mrb[4].mxu0 %vm169_vm1, %v976_v11  ;;  %939 = vmatmul.mubr.msk.bf16.gmra.mrb[4].mxu1 %vm169_vm1, %v977_v12  ;;  %v646_v44 = vld [vmem:[%s1439_s6 + $0x30] sm:$0x3]  ;;  %v803_v45 = vld [vmem:[%s1440_s7] sm:$0xff]  ;;  %v804_v46 = vld [vmem:[%s1440_s7 + $0x8] sm:$0xff] }
  0x10   :  { %250 = vmatprep.mubr.bf16.mxu0 %v1124_v1  ;;  %290 = vmatprep.mubr.bf16.mxu1 %v1124_v1  ;;  %v805_v47 = vld [vmem:[%s1440_s7 + $0x10] sm:$0xff]  ;;  %v806_v48 = vld [vmem:[%s1440_s7 + $0x18] sm:$0xff]  ;;  %v807_v49 = vld [vmem:[%s1440_s7 + $0x20] sm:$0xff] }
  0x11   :  { %95 = vperm.xlu0 %969, %v56_v15   ;;  %100 = vperm.xlu1 %970, %v57_v16   ;;  %v808_v50 = vld [vmem:[%s1440_s7 + $0x28] sm:$0xff]  ;;  %v809_v51 = vld [vmem:[%s1440_s7 + $0x30] sm:$0x3]  ;;  %v885_v52 = vld [vmem:[#allocation2] sm:$0x1] }
  0x15   :  { %105 = vperm.xlu0 %969, %v58_v19   ;;  %110 = vperm.xlu1 %970, %v59_v20  }
  0x17   :  { %936 = vmatmul.mubr.msk.bf16.gmra.mrb[8].mxu0 %vm169_vm1, %v978_v17  ;;  %940 = vmatmul.mubr.msk.bf16.gmra.mrb[8].mxu1 %vm169_vm1, %v979_v18 }
  0x18   :  { %260 = vmatprep.mubr.bf16.mxu0 %v1124_v1  ;;  %524 = vmatprep.mubr.bf16.mxu1 %v1124_v1 }
  0x19   :  { %115 = vperm.xlu0 %969, %v60_v21   ;;  %120 = vperm.xlu1 %970, %v61_v22  }
  0x1d   :  { %125 = vperm.xlu0 %969, %v62_v24   ;;  %367 = vperm.xlu1 %970, %v352_v25  }
  0x1f   :  { %937 = vmatmul.mubr.msk.bf16.gmra.mrb[12].mxu0 %vm169_vm1, %v980_v23 }
  0x20   :  { %750 = vmatprep.mubr.bf16.mxu0 %v1124_v1 }
  0x21   :  { %372 = vperm.xlu0 %969, %v353_v26   ;;  %377 = vperm.xlu1 %970, %v354_v27  }
  0x25   :  { %382 = vperm.xlu0 %969, %v355_v28   ;;  %387 = vperm.xlu1 %970, %v356_v29  }
  0x29   :  { %392 = vperm.xlu0 %969, %v357_v30   ;;  %397 = vperm.xlu1 %970, %v358_v31  }
  0x2d   :  { %402 = vperm.xlu0 %969, %v359_v32   ;;  %407 = vperm.xlu1 %970, %v360_v33  }
  0x31   :  { %412 = vperm.xlu0 %969, %v361_v34   ;;  %417 = vperm.xlu1 %970, %v362_v35  }
  0x35   :  { %422 = vperm.xlu0 %969, %v363_v36   ;;  %427 = vperm.xlu1 %970, %v364_v37  }
  0x39   :  { %649 = vperm.xlu0 %969, %v640_v38   ;;  %654 = vperm.xlu1 %970, %v641_v39  }
  0x3d   :  { %659 = vperm.xlu0 %969, %v642_v40   ;;  %664 = vperm.xlu1 %970, %v643_v41  }
  0x41   :  { %669 = vperm.xlu0 %969, %v644_v42   ;;  %674 = vperm.xlu1 %970, %v645_v43  }
  0x45   :  { %679 = vperm.xlu0 %969, %v646_v44   ;;  %812 = vperm.xlu1 %970, %v803_v45  }
  0x49   :  { %817 = vperm.xlu0 %969, %v804_v46   ;;  %822 = vperm.xlu1 %970, %v805_v47  }
  0x4d   :  { %827 = vperm.xlu0 %969, %v806_v48   ;;  %832 = vperm.xlu1 %970, %v807_v49  }
  0x51   :  { %837 = vperm.xlu0 %969, %v808_v50   ;;  %842 = vperm.xlu1 %970, %v809_v51  }
  0x55   :  { %888 = vperm.xlu0 %969, %v885_v52  }
  0x84   :  { %v66_v53 = vpop.permute.xlu0 %65  ;;  %v76_v54 = vpop.permute.xlu1 %75 }
  0x88   :  { %v71_v55 = vpop.permute.xlu0 %70  ;;  %v81_v56 = vpop.permute.xlu1 %80 }
  0x8c   :  { %v1347_v57 = vpop.permute.xlu0 %85  ;;  %v1349_v58 = vpop.permute.xlu1 %90 }
  0x90   :  { %v1351_v59 = vpop.permute.xlu0 %95  ;;  %v1353_v60 = vpop.permute.xlu1 %100 }
  0x94   :  { %v106_v61 = vpop.permute.xlu0 %105  ;;  %v111_v62 = vpop.permute.xlu1 %110 }
  0x98   :  { %v116_v16 = vpop.permute.xlu0 %115  ;;  %v121_v17 = vpop.permute.xlu1 %120 }
  0xda   :  { %v232_v63 = vpop.f32.mrb[0].mxu0  ;;  %v272_v0 = vpop.f32.mrb[0].mxu1 }
  0xdb   :  { %v233_v2 = vadd.f32 %v232_v63, %v66_v53  ;;  %v234_v3 = vpop.f32.mrb[1].mxu0  ;;  %v274_v4 = vpop.f32.mrb[1].mxu1  ;;  %v273_v10 = vadd.f32 %v272_v0, %v106_v61 }
  0xdc   :  { %v235_v5 = vadd.f32 %v234_v3, %v66_v53  ;;  %v236_v6 = vpop.f32.mrb[2].mxu0  ;;  %v276_v7 = vpop.f32.mrb[2].mxu1  ;;  %v275_v13 = vadd.f32 %v274_v4, %v106_v61 }
  0xdd   :  { %992 = vtanh.f32 %v233_v2  ;;  %v237_v8 = vadd.f32 %v236_v6, %v71_v55  ;;  %v238_v9 = vpop.f32.mrb[3].mxu0  ;;  %v278_v11 = vpop.f32.mrb[3].mxu1  ;;  %v277_v14 = vadd.f32 %v276_v7, %v111_v62 }
  0xde   :  { %994 = vtanh.f32 %v235_v5  ;;  %v239_v12 = vadd.f32 %v238_v9, %v71_v55  ;;  %v279_v15 = vadd.f32 %v278_v11, %v111_v62 }
  0xdf   :  { %996 = vtanh.f32 %v237_v8 }
  0xe0   :  { %998 = vtanh.f32 %v239_v12 }
  0xe1   :  { %1000 = vtanh.f32 %v273_v10 }
  0xe2   :  { %1002 = vtanh.f32 %v275_v13  ;;  %v242_v18 = vpop.f32.mrb[4].mxu0  ;;  %v282_v19 = vpop.f32.mrb[4].mxu1 }
  0xe3   :  { %1004 = vtanh.f32 %v277_v14  ;;  %v243_v20 = vadd.f32 %v242_v18, %v76_v54  ;;  %v283_v21 = vadd.f32 %v282_v19, %v116_v16  ;;  %v244_v22 = vpop.f32.mrb[5].mxu0  ;;  %v284_v23 = vpop.f32.mrb[5].mxu1 }
  0xe4   :  { %1006 = vtanh.f32 %v279_v15  ;;  %v245_v24 = vadd.f32 %v244_v22, %v76_v54  ;;  %v285_v25 = vadd.f32 %v284_v23, %v116_v16  ;;  %v246_v26 = vpop.f32.mrb[6].mxu0  ;;  %v286_v27 = vpop.f32.mrb[6].mxu1 }
  0xe5   :  { %1008 = vtanh.f32 %v243_v20  ;;  %v247_v28 = vadd.f32 %v246_v26, %v81_v56  ;;  %v248_v29 = vpop.f32.mrb[7].mxu0  ;;  %v288_v30 = vpop.f32.mrb[7].mxu1  ;;  %v287_v31 = vadd.f32 %v286_v27, %v121_v17 }
  0xe6   :  { %1010 = vtanh.f32 %v283_v21  ;;  %v249_v33 = vadd.f32 %v248_v29, %v81_v56  ;;  %v289_v35 = vadd.f32 %v288_v30, %v121_v17  ;;  %v126_v18 = vpop.permute.xlu0 %125 }
  0xe7   :  { %v993_v32 = vpop.eup %992  ;;  %1012 = vtanh.f32 %v245_v24 }
  0xe8   :  { %v995_v34 = vpop.eup %994  ;;  %1014 = vtanh.f32 %v285_v25 }
  0xe9   :  { %v997_v36 = vpop.eup %996  ;;  %1016 = vtanh.f32 %v247_v28 }
  0xea   :  { %v999_v37 = vpop.eup %998  ;;  %1018 = vtanh.f32 %v287_v31  ;;  %v252_v38 = vpop.f32.mrb[8].mxu0  ;;  %v338_v40 = vpack.c.bf16 %v997_v36, %v993_v32  ;;  %v982_v36 = vld [vmem:[%s1441_s3 + $0x8] sm:$0xff]  }
  0xeb   :  { %v292_v39 = vpop.f32.mrb[8].mxu1  ;;  %v1355_v41 = vpop.eup %1000  ;;  %1020 = vtanh.f32 %v249_v33  ;;  %v253_v42 = vadd.f32 %v252_v38, %v1347_v57  ;;  %v339_v45 = vpack.c.bf16 %v999_v37, %v995_v34  ;;  %v983_v37 = vld [vmem:[%s1441_s3 + $0x10] sm:$0xff]   ;;  %v984_v38 = vld [vmem:[%s1441_s3 + $0x18] sm:$0xff]  }
  0xec   :  { %v254_v43 = vpop.f32.mrb[9].mxu0  ;;  %v294_v44 = vpop.f32.mrb[9].mxu1  ;;  %1022 = vtanh.f32 %v289_v35  ;;  %v293_v20 = vadd.f32 %v292_v39, %v126_v18  ;;  %v981_v35 = vld [vmem:[%s1441_s3] sm:$0xff]  }
  0xed   :  { %v1358_v46 = vpop.eup %1002  ;;  %v255_v47 = vadd.f32 %v254_v43, %v1347_v57  ;;  %v256_v48 = vpop.f32.mrb[10].mxu0  ;;  %492 = vmatprep.subr.bf16.mxu1 %v339_v45  ;;  %1024 = vtanh.f32 %v253_v42  ;;  %v295_v22 = vadd.f32 %v294_v44, %v126_v18  ;;  %v985_v39 = vld [vmem:[%s1441_s3 + $0x20] sm:$0xff]  }
  0xee   :  { %v296_v49 = vpop.f32.mrb[10].mxu1  ;;  %v1361_v50 = vpop.eup %1004  ;;  %v257_v51 = vadd.f32 %v256_v48, %v1349_v58  ;;  %493 = vmatpush1.bf16.msra.mxu1 %v338_v40  ;;  %v986_v40 = vld [vmem:[%s1441_s3 + $0x28] sm:$0xff]  }
  0xef   :  { %v258_v52 = vpop.f32.mrb[11].mxu0  ;;  %v297_v53 = vpop.f32.mrb[11].mxu1  ;;  %v346_v56 = vpack.c.bf16 %v1361_v50, %v1355_v41  ;;  %1026 = vtanh.f32 %v255_v47  ;;  %v987_v41 = vld [vmem:[%s1441_s3 + $0x30] ss:$0 sps:$4 sm:$0x33]  }
  0xf0   :  { %v1007_v54 = vpop.eup %1006  ;;  %v259_v55 = vadd.f32 %v258_v52, %v1349_v58  ;;  %1028 = vtanh.f32 %v257_v51  ;;  %v368_v42 = vpop.permute.xlu1 %367 }
  0xf1   :  { %v1009_v61 = vpop.eup %1008  ;;  %v347_v57 = vpack.c.bf16 %v1007_v54, %v1358_v46  ;;  %v373_v46 = vpop.permute.xlu0 %372 }
  0xf2   :  { %v1011_v62 = vpop.eup %1010  ;;  %1030 = vtanh.f32 %v259_v55  ;;  %v262_v2 = vpop.f32.mrb[12].mxu0 }
  0xf3   :  { %v1013_v63 = vpop.eup %1012  ;;  %v263_v4 = vadd.f32 %v262_v2, %v1351_v59  ;;  %v264_v5 = vpop.f32.mrb[13].mxu0 }
  0xf4   :  { %v1015_v0 = vpop.eup %1014  ;;  %v265_v6 = vadd.f32 %v264_v5, %v1351_v59  ;;  %v266_v7 = vpop.f32.mrb[14].mxu0 }
  0xf5   :  { %v1017_v3 = vpop.eup %1016  ;;  %1032 = vtanh.f32 %v263_v4  ;;  %v267_v10 = vadd.f32 %v266_v7, %v1353_v60  ;;  %v268_v11 = vpop.f32.mrb[15].mxu0 }
  0xf6   :  { %v1019_v58 = vpop.eup %1018  ;;  %v340_v8 = vpack.c.bf16 %v1017_v3, %v1009_v61  ;;  %1034 = vtanh.f32 %v265_v6  ;;  %v269_v14 = vadd.f32 %v268_v11, %v1353_v60  ;;  %v378_v52 = vpop.permute.xlu1 %377 }
  0xf7   :  { %v1021_v9 = vpop.eup %1020  ;;  %v348_v12 = vpack.c.bf16 %v1019_v58, %v1011_v62  ;;  %1036 = vtanh.f32 %v267_v10 }
  0xf8   :  { %v1023_v13 = vpop.eup %1022  ;;  %v341_v15 = vpack.c.bf16 %v1021_v9, %v1013_v63  ;;  %1038 = vtanh.f32 %v269_v14 }
  0xf9   :  { %v349_v16 = vpack.c.bf16 %v1023_v13, %v1015_v0  ;;  %v1025_v17 = vpop.eup %1024  ;;  %1040 = vtanh.f32 %v293_v20 }
  0xfa   :  { %494 = vmatprep.subr.bf16.mxu1 %v341_v15  ;;  %v1027_v59 = vpop.eup %1026  ;;  %1042 = vtanh.f32 %v295_v22  ;;  %v388_v58 = vpop.permute.xlu1 %387 }
  0xfb   :  { %495 = vmatpush1.bf16.msra.mxu1 %v340_v8  ;;  %v1029_v19 = vpop.eup %1028 }
  0xfc   :  { %v1031_v21 = vpop.eup %1030  ;;  %v342_v23 = vpack.c.bf16 %v1029_v19, %v1025_v17 }
  0xfd   :  { %v343_v24 = vpack.c.bf16 %v1031_v21, %v1027_v59 }
  0xfe   :  { %v398_v20 = vpop.permute.xlu1 %397 }
  0xff   :  { %v1033_v25 = vpop.eup %1032  ;;  %496 = vmatprep.subr.bf16.mxu1 %v343_v24 }
 0x100   :  { %v1035_v26 = vpop.eup %1034  ;;  %497 = vmatpush1.bf16.msra.mxu1 %v342_v23 }
 0x101   :  { %v1037_v60 = vpop.eup %1036 }
 0x102   :  { %v1039_v27 = vpop.eup %1038  ;;  %v344_v28 = vpack.c.bf16 %v1037_v60, %v1033_v25 }
 0x103   :  { %v345_v29 = vpack.c.bf16 %v1039_v27, %v1035_v26  ;;  %v1041_v30 = vpop.eup %1040 }
 0x104   :  { %v1043_v31 = vpop.eup %1042  ;;  %v350_v32 = vpack.c.bf16 %v1041_v30, %v1041_v30 }
 0x105   :  { %498 = vmatprep.subr.bf16.mxu1 %v345_v29  ;;  %v351_v33 = vpack.c.bf16 %v1043_v31, %v1043_v31 }
 0x106   :  { %499 = vmatpush1.bf16.msra.mxu1 %v344_v28  ;;  %v487_v34 = vsel %vm485_vm2, %v350_v32, 0 }
 0x107   :  { %500 = vmatprep.subr.bf16.mxu1 %v347_v57 }
 0x10a   :  { %501 = vmatpush1.bf16.msra.mxu1 %v346_v56  ;;  %v383_v56 = vpop.permute.xlu0 %382 }
 0x10b   :  { %502 = vmatprep.subr.bf16.mxu1 %v349_v16 }
 0x10e   :  { %503 = vmatpush1.bf16.msra.mxu1 %v348_v12  ;;  %v393_v11 = vpop.permute.xlu0 %392 }
 0x10f   :  { %948 = vmatprep.subr.msk.bf16.mxu1 %vm485_vm2, %v351_v33 }
 0x112   :  { %505 = vmatpush1.bf16.msra.mxu1 %v487_v34  ;;  %v403_v26 = vpop.permute.xlu0 %402 }
 0x115   :  { %949 = vmatmul.mubr.msk.bf16.vlgmr.msra.gmra.mrb[12].mxu1 %vm463_vm3, %v981_v35  ;;  %v408_v35 = vpop.permute.xlu1 %407 }
 0x116   :  { %534 = vmatprep.mubr.bf16.mxu1 %v1124_v1 }
 0x11d   :  { %950 = vmatmul.mubr.msk.bf16.gmra.mrb[16].mxu1 %vm463_vm3, %v982_v36 }
 0x11e   :  { %544 = vmatprep.mubr.bf16.mxu1 %v1124_v1 }
 0x125   :  { %951 = vmatmul.mubr.msk.bf16.gmra.mrb[20].mxu1 %vm463_vm3, %v983_v37 }
 0x126   :  { %554 = vmatprep.mubr.bf16.mxu1 %v1124_v1 }
 0x12d   :  { %952 = vmatmul.mubr.msk.bf16.gmra.mrb[24].mxu1 %vm463_vm3, %v984_v38 }
 0x12e   :  { %564 = vmatprep.mubr.bf16.mxu1 %v1124_v1 }
 0x135   :  { %953 = vmatmul.mubr.msk.bf16.gmra.mrb[28].mxu1 %vm463_vm3, %v985_v39 }
 0x136   :  { %574 = vmatprep.mubr.bf16.mxu1 %v1124_v1 }
 0x13d   :  { %954 = vmatmul.mubr.msk.bf16.gmra.mrb[32].mxu1 %vm463_vm3, %v986_v40 }
 0x13e   :  { %584 = vmatprep.mubr.bf16.mxu1 %v1124_v1 }
 0x145   :  { %955 = vmatmul.mubr.msk.bf16.gmra.mrb[36].mxu1 %vm463_vm3, %v987_v41  ;;  %v413_v41 = vpop.permute.xlu0 %412 }
 0x1e8   :  { %v526_v43 = vpop.f32.mrb[12].mxu1 }
 0x1e9   :  { %v527_v44 = vadd.f32 %v526_v43, %v368_v42  ;;  %v528_v45 = vpop.f32.mrb[13].mxu1 }
 0x1ea   :  { %v529_v47 = vadd.f32 %v528_v45, %v368_v42  ;;  %v530_v48 = vpop.f32.mrb[14].mxu1 }
 0x1eb   :  { %1044 = vtanh.f32 %v527_v44  ;;  %v531_v49 = vadd.f32 %v530_v48, %v373_v46  ;;  %v532_v50 = vpop.f32.mrb[15].mxu1 }
 0x1ec   :  { %1046 = vtanh.f32 %v529_v47  ;;  %v533_v51 = vadd.f32 %v532_v50, %v373_v46 }
 0x1ed   :  { %1048 = vtanh.f32 %v531_v49 }
 0x1ee   :  { %1050 = vtanh.f32 %v533_v51  ;;  %v418_v51 = vpop.permute.xlu1 %417 }
 0x1f0   :  { %v536_v53 = vpop.f32.mrb[16].mxu1 }
 0x1f1   :  { %v537_v54 = vadd.f32 %v536_v53, %v378_v52  ;;  %v538_v55 = vpop.f32.mrb[17].mxu1 }
 0x1f2   :  { %v539_v61 = vadd.f32 %v538_v55, %v378_v52  ;;  %v540_v57 = vpop.f32.mrb[18].mxu1 }
 0x1f3   :  { %1052 = vtanh.f32 %v537_v54  ;;  %v541_v62 = vadd.f32 %v540_v57, %v383_v56  ;;  %v542_v63 = vpop.f32.mrb[19].mxu1 }
 0x1f4   :  { %1054 = vtanh.f32 %v539_v61  ;;  %v543_v0 = vadd.f32 %v542_v63, %v383_v56  ;;  %v423_v61 = vpop.permute.xlu0 %422 }
 0x1f5   :  { %v1045_v2 = vpop.eup %1044  ;;  %1056 = vtanh.f32 %v541_v62 }
 0x1f6   :  { %v1047_v3 = vpop.eup %1046  ;;  %1058 = vtanh.f32 %v543_v0 }
 0x1f7   :  { %v1049_v4 = vpop.eup %1048 }
 0x1f8   :  { %v1051_v5 = vpop.eup %1050  ;;  %v546_v6 = vpop.f32.mrb[20].mxu1  ;;  %v626_v7 = vpack.c.bf16 %v1049_v4, %v1045_v2 }
 0x1f9   :  { %v547_v8 = vadd.f32 %v546_v6, %v388_v58  ;;  %v548_v9 = vpop.f32.mrb[21].mxu1  ;;  %v627_v10 = vpack.c.bf16 %v1051_v5, %v1047_v3  ;;  %v428_v6 = vpop.permute.xlu1 %427 }
 0x1fa   :  { %v549_v12 = vadd.f32 %v548_v9, %v388_v58  ;;  %v550_v13 = vpop.f32.mrb[22].mxu1 }
 0x1fb   :  { %1060 = vtanh.f32 %v547_v8  ;;  %v551_v14 = vadd.f32 %v550_v13, %v393_v11  ;;  %v552_v15 = vpop.f32.mrb[23].mxu1  ;;  %718 = vmatprep.subr.bf16.mxu0 %v627_v10 }
 0x1fc   :  { %1062 = vtanh.f32 %v549_v12  ;;  %v553_v16 = vadd.f32 %v552_v15, %v393_v11  ;;  %719 = vmatpush1.bf16.msra.mxu0 %v626_v7 }
 0x1fd   :  { %v1053_v17 = vpop.eup %1052  ;;  %1064 = vtanh.f32 %v551_v14 }
 0x1fe   :  { %v1055_v59 = vpop.eup %1054  ;;  %1066 = vtanh.f32 %v553_v16 }
 0x1ff   :  { %v1057_v18 = vpop.eup %1056 }
 0x200   :  { %v1059_v19 = vpop.eup %1058  ;;  %v556_v21 = vpop.f32.mrb[24].mxu1  ;;  %v628_v22 = vpack.c.bf16 %v1057_v18, %v1053_v17 }
 0x201   :  { %v557_v23 = vadd.f32 %v556_v21, %v398_v20  ;;  %v558_v24 = vpop.f32.mrb[25].mxu1  ;;  %v629_v25 = vpack.c.bf16 %v1059_v19, %v1055_v59 }
 0x202   :  { %v559_v60 = vadd.f32 %v558_v24, %v398_v20  ;;  %v560_v27 = vpop.f32.mrb[26].mxu1 }
 0x203   :  { %1068 = vtanh.f32 %v557_v23  ;;  %v561_v28 = vadd.f32 %v560_v27, %v403_v26  ;;  %v562_v29 = vpop.f32.mrb[27].mxu1  ;;  %720 = vmatprep.subr.bf16.mxu0 %v629_v25  ;;  %v988_v25 = vld [vmem:[%s1442_s5] sm:$0xff]   ;;  %v991_v27 = vld [vmem:[%s1442_s5 + $0x18] ss:$0 sps:$4 sm:$0x11]  }
 0x204   :  { %1070 = vtanh.f32 %v559_v60  ;;  %v563_v30 = vadd.f32 %v562_v29, %v403_v26  ;;  %721 = vmatpush1.bf16.msra.mxu0 %v628_v22  ;;  %v989_v26 = vld [vmem:[%s1442_s5 + $0x8] sm:$0xff]   ;;  %v990_v60 = vld [vmem:[%s1442_s5 + $0x10] sm:$0xff]   ;;  %v655_v29 = vpop.permute.xlu1 %654 }
 0x205   :  { %v1061_v31 = vpop.eup %1060  ;;  %1072 = vtanh.f32 %v561_v28  ;;  %v650_v28 = vpop.permute.xlu0 %649 }
 0x206   :  { %v1063_v32 = vpop.eup %1062  ;;  %1074 = vtanh.f32 %v563_v30 }
 0x207   :  { %v1065_v33 = vpop.eup %1064 }
 0x208   :  { %v1067_v34 = vpop.eup %1066  ;;  %v566_v36 = vpop.f32.mrb[28].mxu1  ;;  %v630_v37 = vpack.c.bf16 %v1065_v33, %v1061_v31 }
 0x209   :  { %v567_v38 = vadd.f32 %v566_v36, %v408_v35  ;;  %v568_v39 = vpop.f32.mrb[29].mxu1  ;;  %v631_v40 = vpack.c.bf16 %v1067_v34, %v1063_v32  ;;  %v660_v30 = vpop.permute.xlu0 %659 }
 0x20a   :  { %v569_v42 = vadd.f32 %v568_v39, %v408_v35  ;;  %v570_v43 = vpop.f32.mrb[30].mxu1  ;;  %v665_v34 = vpop.permute.xlu1 %664 }
 0x20b   :  { %1076 = vtanh.f32 %v567_v38  ;;  %v571_v44 = vadd.f32 %v570_v43, %v413_v41  ;;  %v572_v45 = vpop.f32.mrb[31].mxu1  ;;  %722 = vmatprep.subr.bf16.mxu0 %v631_v40 }
 0x20c   :  { %1078 = vtanh.f32 %v569_v42  ;;  %v573_v46 = vadd.f32 %v572_v45, %v413_v41  ;;  %723 = vmatpush1.bf16.msra.mxu0 %v630_v37 }
 0x20d   :  { %v1069_v47 = vpop.eup %1068  ;;  %1080 = vtanh.f32 %v571_v44  ;;  %v670_v37 = vpop.permute.xlu0 %669 }
 0x20e   :  { %v1071_v48 = vpop.eup %1070  ;;  %1082 = vtanh.f32 %v573_v46  ;;  %v675_v40 = vpop.permute.xlu1 %674 }
 0x20f   :  { %v1073_v49 = vpop.eup %1072 }
 0x210   :  { %v1075_v50 = vpop.eup %1074  ;;  %v576_v52 = vpop.f32.mrb[32].mxu1  ;;  %v632_v53 = vpack.c.bf16 %v1073_v49, %v1069_v47 }
 0x211   :  { %v577_v54 = vadd.f32 %v576_v52, %v418_v51  ;;  %v578_v55 = vpop.f32.mrb[33].mxu1  ;;  %v633_v56 = vpack.c.bf16 %v1075_v50, %v1071_v48  ;;  %v680_v42 = vpop.permute.xlu0 %679 }
 0x212   :  { %v579_v57 = vadd.f32 %v578_v55, %v418_v51  ;;  %v580_v62 = vpop.f32.mrb[34].mxu1 }
 0x213   :  { %1084 = vtanh.f32 %v577_v54  ;;  %v581_v63 = vadd.f32 %v580_v62, %v423_v61  ;;  %v582_v0 = vpop.f32.mrb[35].mxu1  ;;  %724 = vmatprep.subr.bf16.mxu0 %v633_v56  ;;  %v813_v54 = vpop.permute.xlu1 %812 }
 0x214   :  { %1086 = vtanh.f32 %v579_v57  ;;  %v583_v2 = vadd.f32 %v582_v0, %v423_v61  ;;  %725 = vmatpush1.bf16.msra.mxu0 %v632_v53 }
 0x215   :  { %v1077_v3 = vpop.eup %1076  ;;  %1088 = vtanh.f32 %v581_v63  ;;  %v818_v53 = vpop.permute.xlu0 %817 }
 0x216   :  { %v1079_v4 = vpop.eup %1078  ;;  %1090 = vtanh.f32 %v583_v2 }
 0x217   :  { %v1081_v5 = vpop.eup %1080 }
 0x218   :  { %v1083_v58 = vpop.eup %1082  ;;  %v586_v7 = vpop.f32.mrb[36].mxu1  ;;  %v634_v8 = vpack.c.bf16 %v1081_v5, %v1077_v3 }
 0x219   :  { %v587_v9 = vadd.f32 %v586_v7, %v428_v6  ;;  %v588_v10 = vpop.f32.mrb[37].mxu1  ;;  %v635_v11 = vpack.c.bf16 %v1083_v58, %v1079_v4 }
 0x21a   :  { %v589_v12 = vadd.f32 %v588_v10, %v428_v6  ;;  %v590_v13 = vpop.f32.mrb[38].mxu1  ;;  %v823_v10 = vpop.permute.xlu1 %822 }
 0x21b   :  { %1092 = vtanh.f32 %v587_v9  ;;  %v591_v14 = vpop.f32.mrb[39].mxu1  ;;  %726 = vmatprep.subr.bf16.mxu0 %v635_v11 }
 0x21c   :  { %1094 = vtanh.f32 %v589_v12  ;;  %727 = vmatpush1.bf16.msra.mxu0 %v634_v8  ;;  %v828_v14 = vpop.permute.xlu0 %827 }
 0x21d   :  { %v1085_v15 = vpop.eup %1084 }
 0x21e   :  { %v1087_v16 = vpop.eup %1086 }
 0x21f   :  { %v1089_v17 = vpop.eup %1088 }
 0x220   :  { %v1091_v59 = vpop.eup %1090  ;;  %v636_v18 = vpack.c.bf16 %v1089_v17, %v1085_v15 }
 0x221   :  { %v637_v19 = vpack.c.bf16 %v1091_v59, %v1087_v16 }
 0x223   :  { %728 = vmatprep.subr.bf16.mxu0 %v637_v19 }
 0x224   :  { %729 = vmatpush1.bf16.msra.mxu0 %v636_v18 }
 0x225   :  { %v1093_v20 = vpop.eup %1092 }
 0x226   :  { %v1095_v21 = vpop.eup %1094  ;;  %v638_v22 = vpack.c.bf16 %v1093_v20, %v1093_v20 }
 0x227   :  { %v639_v23 = vpack.c.bf16 %v1095_v21, %v1095_v21 }
 0x228   :  { %v713_v24 = vsel %vm485_vm2, %v638_v22, 0 }
 0x229   :  { %960 = vmatprep.subr.msk.bf16.mxu0 %vm485_vm2, %v639_v23 }
 0x22a   :  { %731 = vmatpush1.bf16.msra.mxu0 %v713_v24 }
 0x22d   :  { %961 = vmatmul.mubr.msk.bf16.vlgmr.msra.gmra.mrb[16].mxu0 %vm463_vm3, %v988_v25 }
 0x22e   :  { %760 = vmatprep.mubr.bf16.mxu0 %v1124_v1 }
 0x235   :  { %962 = vmatmul.mubr.msk.bf16.gmra.mrb[20].mxu0 %vm463_vm3, %v989_v26 }
 0x236   :  { %770 = vmatprep.mubr.bf16.mxu0 %v1124_v1 }
 0x23d   :  { %963 = vmatmul.mubr.msk.bf16.gmra.mrb[24].mxu0 %vm463_vm3, %v990_v60 }
 0x23e   :  { %780 = vmatprep.mubr.bf16.mxu0 %v1124_v1 }
 0x245   :  { %964 = vmatmul.mubr.msk.bf16.gmra.mrb[28].mxu0 %vm463_vm3, %v991_v27 }
 0x300   :  { %v752_v31 = vpop.f32.mrb[16].mxu0 }
 0x301   :  { %v753_v32 = vadd.f32 %v752_v31, %v650_v28  ;;  %v754_v33 = vpop.f32.mrb[17].mxu0 }
 0x302   :  { %v755_v35 = vadd.f32 %v754_v33, %v650_v28  ;;  %v756_v36 = vpop.f32.mrb[18].mxu0  ;;  %v833_v28 = vpop.permute.xlu1 %832 }
 0x303   :  { %1096 = vtanh.f32 %v753_v32  ;;  %v757_v38 = vadd.f32 %v756_v36, %v655_v29  ;;  %v758_v39 = vpop.f32.mrb[19].mxu0  ;;  %v838_v32 = vpop.permute.xlu0 %837 }
 0x304   :  { %1098 = vtanh.f32 %v755_v35  ;;  %v759_v1 = vadd.f32 %v758_v39, %v655_v29 }
 0x305   :  { %1100 = vtanh.f32 %v757_v38 }
 0x306   :  { %1102 = vtanh.f32 %v759_v1 }
 0x308   :  { %v762_v41 = vpop.f32.mrb[20].mxu0 }
 0x309   :  { %v763_v43 = vadd.f32 %v762_v41, %v660_v30  ;;  %v764_v44 = vpop.f32.mrb[21].mxu0  ;;  %v843_v41 = vpop.permute.xlu1 %842 }
 0x30a   :  { %v765_v45 = vadd.f32 %v764_v44, %v660_v30  ;;  %v766_v46 = vpop.f32.mrb[22].mxu0 }
 0x30b   :  { %1104 = vtanh.f32 %v763_v43  ;;  %v767_v47 = vadd.f32 %v766_v46, %v665_v34  ;;  %v768_v48 = vpop.f32.mrb[23].mxu0  ;;  %v891_v46 = vlaneseq }
 0x30c   :  { %1106 = vtanh.f32 %v765_v45  ;;  %v769_v49 = vadd.f32 %v768_v48, %v665_v34 }
 0x30d   :  { %v1097_v50 = vpop.eup %1096  ;;  %1108 = vtanh.f32 %v767_v47  ;;  %vm917_vm4 = vcmp.lt.s32.totalorder %v891_v46, 256 }
 0x30e   :  { %v1099_v51 = vpop.eup %1098  ;;  %1110 = vtanh.f32 %v769_v49  ;;  %v845_v56 = vmul.f32 %v1097_v50, %v813_v54 }
 0x30f   :  { %v1101_v52 = vpop.eup %1100  ;;  %v846_v62 = vmul.f32 %v1099_v51, %v813_v54 }
 0x310   :  { %v1103_v55 = vpop.eup %1102  ;;  %v847_v61 = vmul.f32 %v1101_v52, %v818_v53  ;;  %v772_v57 = vpop.f32.mrb[24].mxu0  ;;  %v892_v52 = vshrl.u32 %v891_v46, 7 }
 0x311   :  { %v848_v63 = vmul.f32 %v1103_v55, %v818_v53  ;;  %v773_v0 = vadd.f32 %v772_v57, %v670_v37  ;;  %v774_v2 = vpop.f32.mrb[25].mxu0 }
 0x312   :  { %v859_v3 = vadd.f32 %v847_v61, %v845_v56  ;;  %v775_v4 = vadd.f32 %v774_v2, %v670_v37  ;;  %v776_v5 = vpop.f32.mrb[26].mxu0  ;;  %v1125_v56 = vmov 1966171168  }
 0x313   :  { %v872_v58 = vadd.f32 %v848_v63, %v846_v62  ;;  %1112 = vtanh.f32 %v773_v0  ;;  %v777_v6 = vadd.f32 %v776_v5, %v675_v40  ;;  %v778_v7 = vpop.f32.mrb[27].mxu0  ;;  %v901_v61 = vunpack.c.l.s4 %v1125_v56  ;;  %v889_v0 = vpop.permute.xlu0 %888 }
 0x314   :  { %1114 = vtanh.f32 %v775_v4  ;;  %v779_v8 = vadd.f32 %v778_v7, %v675_v40  ;;  %v893_v62 = vsub.s32 0, %v892_v52 }
 0x315   :  { %v1105_v9 = vpop.eup %1104  ;;  %1116 = vtanh.f32 %v777_v6  ;;  %v902_v4 = vunpack.c.0.s8 %v901_v61 }
 0x316   :  { %v1107_v11 = vpop.eup %1106  ;;  %v849_v12 = vmul.f32 %v1105_v9, %v823_v10  ;;  %1118 = vtanh.f32 %v779_v8 }
 0x317   :  { %v1109_v13 = vpop.eup %1108  ;;  %v850_v15 = vmul.f32 %v1107_v11, %v823_v10  ;;  %v905_v9 = vsub.s32 %v902_v4, %v892_v52 }
 0x318   :  { %v1111_v16 = vpop.eup %1110  ;;  %v860_v17 = vadd.f32 %v859_v3, %v849_v12  ;;  %v851_v59 = vmul.f32 %v1109_v13, %v828_v14  ;;  %v782_v18 = vpop.f32.mrb[28].mxu0 }
 0x319   :  { %v873_v19 = vadd.f32 %v872_v58, %v850_v15  ;;  %v852_v20 = vmul.f32 %v1111_v16, %v828_v14  ;;  %v783_v21 = vadd.f32 %v782_v18, %v680_v42  ;;  %v784_v22 = vpop.f32.mrb[29].mxu0  ;;  %v894_v58 = vrot.slane %v889_v0, %v893_v62 }
 0x31a   :  { %v861_v23 = vadd.f32 %v860_v17, %v851_v59  ;;  %v785_v24 = vadd.f32 %v784_v22, %v680_v42  ;;  %v786_v25 = vpop.f32.mrb[30].mxu0 }
 0x31b   :  { %v874_v26 = vadd.f32 %v873_v19, %v852_v20  ;;  %1120 = vtanh.f32 %v783_v21  ;;  %v787_v60 = vpop.f32.mrb[31].mxu0 }
 0x31c   :  { %1122 = vtanh.f32 %v785_v24 }
 0x31d   :  { %v1113_v27 = vpop.eup %1112 }
 0x31e   :  { %v1115_v29 = vpop.eup %1114  ;;  %v853_v30 = vmul.f32 %v1113_v27, %v833_v28 }
 0x31f   :  { %v1117_v31 = vpop.eup %1116  ;;  %v854_v33 = vmul.f32 %v1115_v29, %v833_v28 }
 0x320   :  { %v1119_v34 = vpop.eup %1118  ;;  %v862_v35 = vadd.f32 %v861_v23, %v853_v30  ;;  %v855_v36 = vmul.f32 %v1117_v31, %v838_v32 }
 0x321   :  { %v875_v37 = vadd.f32 %v874_v26, %v854_v33  ;;  %v856_v38 = vmul.f32 %v1119_v34, %v838_v32 }
 0x322   :  { %v863_v39 = vadd.f32 %v862_v35, %v855_v36 }
 0x323   :  { %v876_v1 = vadd.f32 %v875_v37, %v856_v38 }
 0x325   :  { %v1121_v40 = vpop.eup %1120 }
 0x326   :  { %v1123_v42 = vpop.eup %1122  ;;  %v857_v43 = vmul.f32 %v1121_v40, %v843_v41 }
 0x327   :  { %v858_v44 = vmul.f32 %v1123_v42, %v843_v41 }
 0x328   :  { %v864_v45 = vsel %vm485_vm2, %v857_v43, 0.0 }
 0x329   :  { %v865_v47 = vadd.f32 %v864_v45, %v863_v39  ;;  %v877_v48 = vsel %vm485_vm2, %v858_v44, 0.0 }
 0x32a   :  { %v878_v49 = vadd.f32 %v877_v48, %v876_v1 }
 0x32b   :  { %v866_v50 = vrot.slane %v865_v47, 4 }
 0x32c   :  { %v879_v51 = vrot.slane %v878_v49, 4 }
 0x32d   :  { %v867_v53 = vadd.f32 %v866_v50, %v865_v47 }
 0x32e   :  { %v880_v54 = vadd.f32 %v879_v51, %v878_v49 }
 0x32f   :  { %v868_v55 = vrot.slane %v867_v53, 2 }
 0x330   :  { %v881_v57 = vrot.slane %v880_v54, 2 }
 0x331   :  { %v869_v63 = vadd.f32 %v868_v55, %v867_v53 }
 0x332   :  { %v882_v2 = vadd.f32 %v881_v57, %v880_v54 }
 0x333   :  { %v870_v3 = vrot.slane %v869_v63, 1 }
 0x334   :  { %v883_v5 = vrot.slane %v882_v2, 1 }
 0x335   :  { %v871_v6 = vadd.f32 %v870_v3, %v869_v63 }
 0x336   :  { %v884_v7 = vadd.f32 %v883_v5, %v882_v2 }
 0x337   :  { %v895_v8 = vadd.f32 %v894_v58, %v871_v6 }
 0x338   :  { %v896_v10 = vadd.f32 %v894_v58, %v884_v7 }
 0x33a   :  { %v899_v11 = vcombine.low %v895_v8, %v896_v10 }
 0x33c   :  { %v906_v12 = vrot.slane %v899_v11, %v905_v9 }
 0x33e   :  { %v913_v13 = vrot.slane %v906_v12, %v905_v9 }
 0x340   :  { %919 = vst.msk [vmem:[%s1443_s9] sm:$0x3] %vm917_vm4, %v913_v13 }

</bundles_post_ra>
